<compile_context>
chip_gen: v5e
topology: v5e:2x2
jax: 0.10.0
libtpu: 0.0.40
codegen_flags: <defaults>
</compile_context>

<pallas_src>
import jax
import jax.numpy as jnp
from jax.experimental import pallas as pl
from jax.experimental.pallas import tpu as pltpu

NUM_LAYERS = 7
LAYER_DIMS = [28, 32, 64, 128, 256, 128, 64, 2]   # input 28 -> ... -> 2 classes
BN_EPS = 1e-5

# Padded (K, N) per layer (K padded to real-or-128-multiple, N to 128-multiple).
PADDED_DIMS = [(28, 128), (128, 128), (128, 128), (128, 256),
               (256, 128), (128, 128), (128, 128)]
# Layers whose padded weight is exactly 128x128 (stacked into one array).
STACKED_LAYERS = (1, 2, 5, 6)


def mlp_kernel(x_ref, w0_ref, wstack_ref, w3_ref, w4_ref, b_ref, o_ref):
    """Fused 7-layer MLP forward (BN folded, ReLU6 between layers).

      x_ref     : (TB, 28)        bf16   one batch tile, unpadded feature lanes
      w0_ref    : (28, 128)       bf16   layer 0 weight (BN folded)
      wstack_ref: (4, 128, 128)   bf16   layers 1, 2, 5, 6 weights
      w3_ref    : (128, 256)      bf16   layer 3 weight
      w4_ref    : (256, 128)      bf16   layer 4 weight
      b_ref     : (8, 256)        f32    per-layer biases (BN folded), zero-padded
      o_ref     : (TB, 128)       bf16   padded logits (real width 2)
    """

    def layer(h_bf16, w_bf16, bias_row, bias_width, relu6):
        b = b_ref[pl.ds(bias_row, 1), pl.ds(0, bias_width)]           # (1, width) f32
        z = jnp.dot(h_bf16, w_bf16, preferred_element_type=jnp.float32) + b
        if relu6:
            z = jnp.clip(z, 0.0, 6.0)                                 # ReLU6 (f32)
        return z.astype(jnp.bfloat16)                                 # bf16 into next dot

    h = x_ref[...]                                   # (TB, 28) bf16
    h = layer(h, w0_ref[...],     0, 128, True)      # 28  -> 32  (pad 128)
    h = layer(h, wstack_ref[0],   1, 128, True)      # 32  -> 64
    h = layer(h, wstack_ref[1],   2, 128, True)      # 64  -> 128
    h = layer(h, w3_ref[...],     3, 256, True)      # 128 -> 256
    h = layer(h, w4_ref[...],     4, 128, True)      # 256 -> 128
    h = layer(h, wstack_ref[2],   5, 128, True)      # 128 -> 64
    h = layer(h, wstack_ref[3],   6, 128, False)     # 128 -> 2 (classifier, no act)
    o_ref[...] = h


def init_params(key):
    """Deterministic synthetic parameters with BatchNorm folded in (eval mode).

    Returns:
      params: (w0, wstack, w3, w4, bslab) ready for the kernel
      folded: list of (W_folded_f32, b_folded_f32) for the pure-JAX reference
    """
    folded = []
    for l in range(NUM_LAYERS):
        din, dout = LAYER_DIMS[l], LAYER_DIMS[l + 1]
        key, kw, kb, kg, kbe, km, kv = jax.random.split(key, 7)
        W = jax.random.normal(kw, (din, dout), jnp.float32) / jnp.sqrt(jnp.float32(din))
        b = 0.1 * jax.random.normal(kb, (dout,), jnp.float32)
        if l < NUM_LAYERS - 1:
            gamma = 1.0 + 0.1 * jax.random.normal(kg, (dout,), jnp.float32)
            beta = 0.1 * jax.random.normal(kbe, (dout,), jnp.float32)
            r_mean = 0.1 * jax.random.normal(km, (dout,), jnp.float32)
            r_var = 1.0 + 0.5 * jax.random.uniform(kv, (dout,), jnp.float32)
            scale = gamma / jnp.sqrt(r_var + BN_EPS)
            shift = beta - r_mean * scale
            W_f = W * scale[None, :]                  # fold BN into weight columns
            b_f = b * scale + shift                   # fold BN into bias
        else:
            W_f, b_f = W, b
        folded.append((W_f, b_f))

    def pad_w(W_f, Kp, Np):
        din, dout = W_f.shape
        # Padded rows/columns are exactly zero -> padded activation lanes stay zero
        # through bias add + ReLU6 into the next layer (correctness invariant).
        return (jnp.zeros((Kp, Np), jnp.float32)
                .at[:din, :dout].set(W_f).astype(jnp.bfloat16))

    w0 = pad_w(folded[0][0], *PADDED_DIMS[0])                         # (28, 128)
    wstack = jnp.stack([pad_w(folded[l][0], *PADDED_DIMS[l])
                        for l in STACKED_LAYERS])                     # (4, 128, 128)
    w3 = pad_w(folded[3][0], *PADDED_DIMS[3])                         # (128, 256)
    w4 = pad_w(folded[4][0], *PADDED_DIMS[4])                         # (256, 128)

    bslab = jnp.zeros((8, 256), jnp.float32)                          # biases, padded lanes = 0
    for l in range(NUM_LAYERS):
        b_f = folded[l][1]
        bslab = bslab.at[l, :b_f.shape[0]].set(b_f)

    return (w0, wstack, w3, w4, bslab), folded


def pose_classifier_forward(x, params):
    """x: (B, 28) float32 -> logits (B, 2) float32."""
    w0, wstack, w3, w4, bslab = params
    B = x.shape[0]
    D_IN = LAYER_DIMS[0]        # 28 (unpadded feature lanes)
    D_OUT_P = 128               # final layer (width 2) padded to one lane tile

    # Batch tiling: small batches -> single tile (sublane-padded to 16 for bf16);
    # large batches -> 512-row tiles on a parallel grid axis (>=2 steps feed both
    # TensorCores on v7x; VMEM use stays < 3 MiB).
    TB = 512
    if B <= TB:
        Bp = max(16, ((B + 15) // 16) * 16)
        TB = Bp
    else:
        Bp = ((B + TB - 1) // TB) * TB
    nb = Bp // TB

    x_bf = x.astype(jnp.bfloat16)
    if Bp != B:
        x_bf = jnp.pad(x_bf, ((0, Bp - B), (0, 0)))

    # Advisory cost hint (tiny kernel; keeps XLA from mis-scheduling around it).
    flops = 2 * Bp * sum(kp * np_ for kp, np_ in PADDED_DIMS)
    param_bytes = sum(int(p.size) * p.dtype.itemsize for p in (w0, wstack, w3, w4, bslab))
    bytes_accessed = Bp * D_IN * 2 + Bp * D_OUT_P * 2 + param_bytes
    cost = pl.CostEstimate(flops=int(flops), transcendentals=0,
                           bytes_accessed=int(bytes_accessed))

    in_specs = [
        pl.BlockSpec((TB, D_IN), lambda i: (i, 0)),            # x tile (full lane extent)
        # Constant index maps -> parameters stay VMEM-resident across batch tiles.
        pl.BlockSpec(w0.shape, lambda i: (0, 0)),
        pl.BlockSpec(wstack.shape, lambda i: (0, 0, 0)),
        pl.BlockSpec(w3.shape, lambda i: (0, 0)),
        pl.BlockSpec(w4.shape, lambda i: (0, 0)),
        pl.BlockSpec(bslab.shape, lambda i: (0, 0)),
    ]

    out_bf = pl.pallas_call(
        mlp_kernel,
        out_shape=jax.ShapeDtypeStruct((Bp, D_OUT_P), jnp.bfloat16),
        grid=(nb,),
        in_specs=in_specs,
        out_specs=pl.BlockSpec((TB, D_OUT_P), lambda i: (i, 0)),
        compiler_params=pltpu.CompilerParams(
            dimension_semantics=("parallel",)),
        cost_estimate=cost,
    )(x_bf, w0, wstack, w3, w4, bslab)

    return out_bf[:B, :LAYER_DIMS[-1]].astype(jnp.float32)


def reference_forward(x, folded):
    """Pure-JAX reference mirroring the kernel's numerics (bf16 activations/weights,
    f32 accumulation and elementwise, bf16 output)."""
    h = x.astype(jnp.bfloat16)
    for l, (W_f, b_f) in enumerate(folded):
        z = jnp.dot(h, W_f.astype(jnp.bfloat16),
                    preferred_element_type=jnp.float32) + b_f
        if l < NUM_LAYERS - 1:
            z = jnp.clip(z, 0.0, 6.0)
        h = z.astype(jnp.bfloat16)
    return h.astype(jnp.float32)


if __name__ == "__main__":
    key = jax.random.PRNGKey(0)
    key, kx, kx2 = jax.random.split(key, 3)
    params, folded = init_params(key)

    # Small-batch (single tile) check.
    B = 2
    x = jax.random.normal(kx, (B, LAYER_DIMS[0]), jnp.float32)        # (2, 28) keypoints
    logits = jax.block_until_ready(pose_classifier_forward(x, params))
    ref = reference_forward(x, folded)
    assert logits.shape == (B, LAYER_DIMS[-1])
    assert jnp.allclose(logits, ref, rtol=2e-2, atol=2e-2), (logits, ref)

    # Multi-tile (grid) path sanity check.
    B2 = 600
    x2 = jax.random.normal(kx2, (B2, LAYER_DIMS[0]), jnp.float32)
    logits2 = jax.block_until_ready(pose_classifier_forward(x2, params))
    ref2 = reference_forward(x2, folded)
    assert logits2.shape == (B2, LAYER_DIMS[-1])
    assert jnp.allclose(logits2, ref2, rtol=2e-2, atol=2e-2)

    print("KERNEL_OK")
</pallas_src>

<mosaic_0001>
module attributes {stable_mosaic.version = 11 : i64} {
  func.func @mlp_kernel(%arg0: i32, %arg1: memref<16x28xbf16, #tpu.memory_space<vmem>>, %arg2: memref<28x128xbf16, #tpu.memory_space<vmem>>, %arg3: memref<4x128x128xbf16, #tpu.memory_space<vmem>>, %arg4: memref<128x256xbf16, #tpu.memory_space<vmem>>, %arg5: memref<256x128xbf16, #tpu.memory_space<vmem>>, %arg6: memref<8x256xf32, #tpu.memory_space<vmem>>, %arg7: memref<16x128xbf16, #tpu.memory_space<vmem>>) attributes {dimension_semantics = [#tpu.dimension_semantics<parallel>], iteration_bounds = array<i64: 1>, scalar_prefetch = 0 : i64, scratch_operands = 0 : i64, tpu.core_type = #tpu.core_type<tc>, window_params = [{transform_indices = @transform_0, window_bounds = array<i64: 16, 28>}, {pipeline_mode = #tpu.pipeline_mode<synchronous>, transform_indices = @transform_1, window_bounds = array<i64: 28, 128>}, {pipeline_mode = #tpu.pipeline_mode<synchronous>, transform_indices = @transform_2, window_bounds = array<i64: 4, 128, 128>}, {pipeline_mode = #tpu.pipeline_mode<synchronous>, transform_indices = @transform_3, window_bounds = array<i64: 128, 256>}, {pipeline_mode = #tpu.pipeline_mode<synchronous>, transform_indices = @transform_4, window_bounds = array<i64: 256, 128>}, {pipeline_mode = #tpu.pipeline_mode<synchronous>, transform_indices = @transform_5, window_bounds = array<i64: 8, 256>}, {transform_indices = @transform_6, window_bounds = array<i64: 16, 128>}]} {
    %c0 = arith.constant 0 : index
    %c0_0 = arith.constant 0 : index
    %0 = vector.load %arg1[%c0, %c0_0] : memref<16x28xbf16, #tpu.memory_space<vmem>>, vector<16x28xbf16>
    %c0_1 = arith.constant 0 : index
    %c0_2 = arith.constant 0 : index
    %1 = vector.load %arg2[%c0_1, %c0_2] : memref<28x128xbf16, #tpu.memory_space<vmem>>, vector<28x128xbf16>
    %c0_3 = arith.constant 0 : index
    %c0_4 = arith.constant 0 : index
    %2 = vector.load %arg6[%c0_3, %c0_4] : memref<8x256xf32, #tpu.memory_space<vmem>>, vector<1x128xf32>
    %cst = arith.constant dense<0.000000e+00> : vector<16x128xf32>
    %3 = tpu.matmul %0, %1, %cst {dimension_numbers = #tpu.dot_dimension_numbers<[1], [0], [0], [1], [0, 0, 1, 1], [], []>} : vector<16x28xbf16>, vector<28x128xbf16>, vector<16x128xf32> -> vector<16x128xf32>
    %4 = vector.broadcast %2 : vector<1x128xf32> to vector<16x128xf32>
    %5 = arith.addf %3, %4 : vector<16x128xf32>
    %cst_5 = arith.constant 0.000000e+00 : f32
    %cst_6 = arith.constant 6.000000e+00 : f32
    %6 = vector.broadcast %cst_5 : f32 to vector<16x128xf32>
    %7 = arith.maximumf %6, %5 : vector<16x128xf32>
    %8 = vector.broadcast %cst_6 : f32 to vector<16x128xf32>
    %9 = arith.minimumf %8, %7 : vector<16x128xf32>
    %10 = arith.truncf %9 : vector<16x128xf32> to vector<16x128xbf16>
    %c0_7 = arith.constant 0 : index
    %c0_8 = arith.constant 0 : index
    %c0_9 = arith.constant 0 : index
    %11 = vector.load %arg3[%c0_7, %c0_8, %c0_9] : memref<4x128x128xbf16, #tpu.memory_space<vmem>>, vector<1x128x128xbf16>
    %12 = vector.shape_cast %11 : vector<1x128x128xbf16> to vector<128x128xbf16>
    %c1 = arith.constant 1 : index
    %c0_10 = arith.constant 0 : index
    %13 = vector.load %arg6[%c1, %c0_10] : memref<8x256xf32, #tpu.memory_space<vmem>>, vector<1x128xf32>
    %cst_11 = arith.constant dense<0.000000e+00> : vector<16x128xf32>
    %14 = tpu.matmul %10, %12, %cst_11 {dimension_numbers = #tpu.dot_dimension_numbers<[1], [0], [0], [1], [0, 0, 1, 1], [], []>} : vector<16x128xbf16>, vector<128x128xbf16>, vector<16x128xf32> -> vector<16x128xf32>
    %15 = vector.broadcast %13 : vector<1x128xf32> to vector<16x128xf32>
    %16 = arith.addf %14, %15 : vector<16x128xf32>
    %cst_12 = arith.constant 0.000000e+00 : f32
    %cst_13 = arith.constant 6.000000e+00 : f32
    %17 = vector.broadcast %cst_12 : f32 to vector<16x128xf32>
    %18 = arith.maximumf %17, %16 : vector<16x128xf32>
    %19 = vector.broadcast %cst_13 : f32 to vector<16x128xf32>
    %20 = arith.minimumf %19, %18 : vector<16x128xf32>
    %21 = arith.truncf %20 : vector<16x128xf32> to vector<16x128xbf16>
    %c1_14 = arith.constant 1 : index
    %c0_15 = arith.constant 0 : index
    %c0_16 = arith.constant 0 : index
    %22 = vector.load %arg3[%c1_14, %c0_15, %c0_16] : memref<4x128x128xbf16, #tpu.memory_space<vmem>>, vector<1x128x128xbf16>
    %23 = vector.shape_cast %22 : vector<1x128x128xbf16> to vector<128x128xbf16>
    %c2 = arith.constant 2 : index
    %c0_17 = arith.constant 0 : index
    %24 = vector.load %arg6[%c2, %c0_17] : memref<8x256xf32, #tpu.memory_space<vmem>>, vector<1x128xf32>
    %cst_18 = arith.constant dense<0.000000e+00> : vector<16x128xf32>
    %25 = tpu.matmul %21, %23, %cst_18 {dimension_numbers = #tpu.dot_dimension_numbers<[1], [0], [0], [1], [0, 0, 1, 1], [], []>} : vector<16x128xbf16>, vector<128x128xbf16>, vector<16x128xf32> -> vector<16x128xf32>
    %26 = vector.broadcast %24 : vector<1x128xf32> to vector<16x128xf32>
    %27 = arith.addf %25, %26 : vector<16x128xf32>
    %cst_19 = arith.constant 0.000000e+00 : f32
    %cst_20 = arith.constant 6.000000e+00 : f32
    %28 = vector.broadcast %cst_19 : f32 to vector<16x128xf32>
    %29 = arith.maximumf %28, %27 : vector<16x128xf32>
    %30 = vector.broadcast %cst_20 : f32 to vector<16x128xf32>
    %31 = arith.minimumf %30, %29 : vector<16x128xf32>
    %32 = arith.truncf %31 : vector<16x128xf32> to vector<16x128xbf16>
    %c0_21 = arith.constant 0 : index
    %c0_22 = arith.constant 0 : index
    %33 = vector.load %arg4[%c0_21, %c0_22] : memref<128x256xbf16, #tpu.memory_space<vmem>>, vector<128x256xbf16>
    %c3 = arith.constant 3 : index
    %c0_23 = arith.constant 0 : index
    %34 = vector.load %arg6[%c3, %c0_23] : memref<8x256xf32, #tpu.memory_space<vmem>>, vector<1x256xf32>
    %cst_24 = arith.constant dense<0.000000e+00> : vector<16x256xf32>
    %35 = tpu.matmul %32, %33, %cst_24 {dimension_numbers = #tpu.dot_dimension_numbers<[1], [0], [0], [1], [0, 0, 1, 1], [], []>} : vector<16x128xbf16>, vector<128x256xbf16>, vector<16x256xf32> -> vector<16x256xf32>
    %36 = vector.broadcast %34 : vector<1x256xf32> to vector<16x256xf32>
    %37 = arith.addf %35, %36 : vector<16x256xf32>
    %cst_25 = arith.constant 0.000000e+00 : f32
    %cst_26 = arith.constant 6.000000e+00 : f32
    %38 = vector.broadcast %cst_25 : f32 to vector<16x256xf32>
    %39 = arith.maximumf %38, %37 : vector<16x256xf32>
    %40 = vector.broadcast %cst_26 : f32 to vector<16x256xf32>
    %41 = arith.minimumf %40, %39 : vector<16x256xf32>
    %42 = arith.truncf %41 : vector<16x256xf32> to vector<16x256xbf16>
    %c0_27 = arith.constant 0 : index
    %c0_28 = arith.constant 0 : index
    %43 = vector.load %arg5[%c0_27, %c0_28] : memref<256x128xbf16, #tpu.memory_space<vmem>>, vector<256x128xbf16>
    %c4 = arith.constant 4 : index
    %c0_29 = arith.constant 0 : index
    %44 = vector.load %arg6[%c4, %c0_29] : memref<8x256xf32, #tpu.memory_space<vmem>>, vector<1x128xf32>
    %cst_30 = arith.constant dense<0.000000e+00> : vector<16x128xf32>
    %45 = tpu.matmul %42, %43, %cst_30 {dimension_numbers = #tpu.dot_dimension_numbers<[1], [0], [0], [1], [0, 0, 1, 1], [], []>} : vector<16x256xbf16>, vector<256x128xbf16>, vector<16x128xf32> -> vector<16x128xf32>
    %46 = vector.broadcast %44 : vector<1x128xf32> to vector<16x128xf32>
    %47 = arith.addf %45, %46 : vector<16x128xf32>
    %cst_31 = arith.constant 0.000000e+00 : f32
    %cst_32 = arith.constant 6.000000e+00 : f32
    %48 = vector.broadcast %cst_31 : f32 to vector<16x128xf32>
    %49 = arith.maximumf %48, %47 : vector<16x128xf32>
    %50 = vector.broadcast %cst_32 : f32 to vector<16x128xf32>
    %51 = arith.minimumf %50, %49 : vector<16x128xf32>
    %52 = arith.truncf %51 : vector<16x128xf32> to vector<16x128xbf16>
    %c2_33 = arith.constant 2 : index
    %c0_34 = arith.constant 0 : index
    %c0_35 = arith.constant 0 : index
    %53 = vector.load %arg3[%c2_33, %c0_34, %c0_35] : memref<4x128x128xbf16, #tpu.memory_space<vmem>>, vector<1x128x128xbf16>
    %54 = vector.shape_cast %53 : vector<1x128x128xbf16> to vector<128x128xbf16>
    %c5 = arith.constant 5 : index
    %c0_36 = arith.constant 0 : index
    %55 = vector.load %arg6[%c5, %c0_36] : memref<8x256xf32, #tpu.memory_space<vmem>>, vector<1x128xf32>
    %cst_37 = arith.constant dense<0.000000e+00> : vector<16x128xf32>
    %56 = tpu.matmul %52, %54, %cst_37 {dimension_numbers = #tpu.dot_dimension_numbers<[1], [0], [0], [1], [0, 0, 1, 1], [], []>} : vector<16x128xbf16>, vector<128x128xbf16>, vector<16x128xf32> -> vector<16x128xf32>
    %57 = vector.broadcast %55 : vector<1x128xf32> to vector<16x128xf32>
    %58 = arith.addf %56, %57 : vector<16x128xf32>
    %cst_38 = arith.constant 0.000000e+00 : f32
    %cst_39 = arith.constant 6.000000e+00 : f32
    %59 = vector.broadcast %cst_38 : f32 to vector<16x128xf32>
    %60 = arith.maximumf %59, %58 : vector<16x128xf32>
    %61 = vector.broadcast %cst_39 : f32 to vector<16x128xf32>
    %62 = arith.minimumf %61, %60 : vector<16x128xf32>
    %63 = arith.truncf %62 : vector<16x128xf32> to vector<16x128xbf16>
    %c3_40 = arith.constant 3 : index
    %c0_41 = arith.constant 0 : index
    %c0_42 = arith.constant 0 : index
    %64 = vector.load %arg3[%c3_40, %c0_41, %c0_42] : memref<4x128x128xbf16, #tpu.memory_space<vmem>>, vector<1x128x128xbf16>
    %65 = vector.shape_cast %64 : vector<1x128x128xbf16> to vector<128x128xbf16>
    %c6 = arith.constant 6 : index
    %c0_43 = arith.constant 0 : index
    %66 = vector.load %arg6[%c6, %c0_43] : memref<8x256xf32, #tpu.memory_space<vmem>>, vector<1x128xf32>
    %cst_44 = arith.constant dense<0.000000e+00> : vector<16x128xf32>
    %67 = tpu.matmul %63, %65, %cst_44 {dimension_numbers = #tpu.dot_dimension_numbers<[1], [0], [0], [1], [0, 0, 1, 1], [], []>} : vector<16x128xbf16>, vector<128x128xbf16>, vector<16x128xf32> -> vector<16x128xf32>
    %68 = vector.broadcast %66 : vector<1x128xf32> to vector<16x128xf32>
    %69 = arith.addf %67, %68 : vector<16x128xf32>
    %70 = arith.truncf %69 : vector<16x128xf32> to vector<16x128xbf16>
    %c0_45 = arith.constant 0 : index
    %c0_46 = arith.constant 0 : index
    %71 = vector.load %arg7[%c0_45, %c0_46] : memref<16x128xbf16, #tpu.memory_space<vmem>>, vector<16x128xbf16>
    tpu.vector_store %arg7[%c0_45, %c0_46], %70 {strides = array<i32>} : memref<16x128xbf16, #tpu.memory_space<vmem>>, vector<16x128xbf16>,
    return
  }
  func.func @transform_0(%arg0: i32) -> (i32, i32) {
    %c0_i32 = arith.constant 0 : i32
    %c0_i32_0 = arith.constant 0 : i32
    return %arg0, %c0_i32 : i32, i32
  }
  func.func @transform_1(%arg0: i32) -> (i32, i32) {
    %c0_i32 = arith.constant 0 : i32
    %c0_i32_0 = arith.constant 0 : i32
    %c0_i32_1 = arith.constant 0 : i32
    return %c0_i32, %c0_i32_0 : i32, i32
  }
  func.func @transform_2(%arg0: i32) -> (i32, i32, i32) {
    %c0_i32 = arith.constant 0 : i32
    %c0_i32_0 = arith.constant 0 : i32
    %c0_i32_1 = arith.constant 0 : i32
    %c0_i32_2 = arith.constant 0 : i32
    return %c0_i32, %c0_i32_0, %c0_i32_1 : i32, i32, i32
  }
  func.func @transform_3(%arg0: i32) -> (i32, i32) {
    %c0_i32 = arith.constant 0 : i32
    %c0_i32_0 = arith.constant 0 : i32
    %c0_i32_1 = arith.constant 0 : i32
    return %c0_i32, %c0_i32_0 : i32, i32
  }
  func.func @transform_4(%arg0: i32) -> (i32, i32) {
    %c0_i32 = arith.constant 0 : i32
    %c0_i32_0 = arith.constant 0 : i32
    %c0_i32_1 = arith.constant 0 : i32
    return %c0_i32, %c0_i32_0 : i32, i32
  }
  func.func @transform_5(%arg0: i32) -> (i32, i32) {
    %c0_i32 = arith.constant 0 : i32
    %c0_i32_0 = arith.constant 0 : i32
    %c0_i32_1 = arith.constant 0 : i32
    return %c0_i32, %c0_i32_0 : i32, i32
  }
  func.func @transform_6(%arg0: i32) -> (i32, i32) {
    %c0_i32 = arith.constant 0 : i32
    %c0_i32_0 = arith.constant 0 : i32
    return %arg0, %c0_i32 : i32, i32
  }
}

</mosaic_0001>

<bundles_post_ra>
// kernel: tpu_custom_call.1
= control target key start
LH: loop header
LB: loop body
LE: loop exit
PB: predicated region body
PF: predicated region fallthrough
CT: control target
= control target key end

     0   :  { %11 = vsyncpa [#allocation3], 0  ;;  %s1442_s0 = inlined_call_operand.hbm [shape: bf16[16,28], index: 0, kind: input, shape index: {}]   ;;  %s1443_s1 = inlined_call_operand.hbm [shape: bf16[28,128], index: 1, kind: input, shape index: {}]   ;;  %s1444_s2 = inlined_call_operand.hbm [shape: bf16[4,128,128], index: 2, kind: input, shape index: {}]   ;;  %s1445_s3 = inlined_call_operand.hbm [shape: bf16[128,256], index: 3, kind: input, shape index: {}]   ;;  %s1446_s4 = inlined_call_operand.hbm [shape: bf16[256,128], index: 4, kind: input, shape index: {}]   ;;  %s1447_s5 = inlined_call_operand.hbm [shape: f32[8,256], index: 5, kind: input, shape index: {}]   ;;  %s1448_s6 = inlined_call_operand.hbm [shape: bf16[16,128], index: 6, kind: output, shape index: {}]  }
   0x1   :  { %12 = vsyncpa [#allocation6], 0 }
   0x2   :  { %13 = vsyncpa [#allocation9], 0 }
   0x3   :  { %14 = vsyncpa [#allocation12], 0 }
   0x4   :  { %15 = vsyncpa [#allocation4], 0  ;;  %s33_s23 = sshll.u32 %s1443_s1, 4  ;;  %s1360_s24 = smov [#allocation5]   ;;  %s34_s23 = int_to_ptr.hbm [resolvable:$true] %s33_s23 }
   0x5   :  { %s35_s25 = sshll.u32 %s1360_s24, 4  ;;  %s59_s28 = sshll.u32 %s1445_s3, 4  ;;  %s36_s25 = int_to_ptr.vmem [resolvable:$true] %s35_s25  ;;  %s60_s28 = int_to_ptr.hbm [resolvable:$true] %s59_s28 }
   0x6   :  { %s1361_s29 = smov 64   ;;  %s1362_s30 = smov 4  }
   0x7   :  { %41 = dma.hbm_to_vmem [thread:$0]  %s34_s23, 256, %s36_s25, [#allocation6], %s1361_s29, %s1361_s29, %s1362_s30  }
   0x8   :  { %s1363_s7 = smov [#allocation8]   ;;  %s1364_s9 = smov 128  }
   0x9   :  { %s61_s8 = sshll.u32 %s1363_s7, 4  ;;  %s1365_s1 = smov 8   ;;  %s62_s8 = int_to_ptr.vmem [resolvable:$true] %s61_s8 }
   0xa   :  { %67 = dma.hbm_to_vmem [thread:$0]  %s60_s28, 2048, %s62_s8, [#allocation9], %s1364_s9, %s1364_s9, %s1365_s1  }
   0xb   :  { %s20_s12 = sshll.u32 %s1442_s0, 4  ;;  %s1366_s13 = smov [#allocation2]   ;;  %s21_s12 = int_to_ptr.hbm [resolvable:$true] %s20_s12 }
   0xc   :  { %s22_s3 = sshll.u32 %s1366_s13, 4  ;;  %s46_s16 = sshll.u32 %s1444_s2, 4  ;;  %s23_s3 = int_to_ptr.vmem [resolvable:$true] %s22_s3  ;;  %s47_s16 = int_to_ptr.hbm [resolvable:$true] %s46_s16 }
   0xd   :  { %28 = dma.hbm_to_vmem [thread:$0]  %s21_s12, 128, %s23_s3, [#allocation3], %s1361_s29, %s1361_s29, %s1362_s30  }
   0xe   :  { %s1367_s17 = smov [#allocation7]   ;;  %s72_s21 = sshll.u32 %s1446_s4, 4  ;;  %s73_s21 = int_to_ptr.hbm [resolvable:$true] %s72_s21 }
   0xf   :  { %s48_s18 = sshll.u32 %s1367_s17, 4  ;;  %s86_s2 = sshll.u32 %s1447_s5, 4  ;;  %s49_s18 = int_to_ptr.vmem [resolvable:$true] %s48_s18  ;;  %s87_s2 = int_to_ptr.hbm [resolvable:$true] %s86_s2 }
  0x10   :  { %54 = dma.hbm_to_vmem [thread:$0]  %s47_s16, 4096, %s49_s18, [#allocation6], %s1361_s29, %s1361_s29, %s1362_s30  }
  0x11   :  { %s1368_s23 = smov [#allocation10]   ;;  %s1369_s25 = smov [#allocation11]  }
  0x12   :  { %s74_s24 = sshll.u32 %s1368_s23, 4  ;;  %s88_s4 = sshll.u32 %s1369_s25, 4  ;;  %s75_s24 = int_to_ptr.vmem [resolvable:$true] %s74_s24  ;;  %s89_s4 = int_to_ptr.vmem [resolvable:$true] %s88_s4 }
  0x13   :  { %80 = dma.hbm_to_vmem [thread:$0]  %s73_s21, 2048, %s75_s24, [#allocation9], %s1361_s29, %s1361_s29, %s1362_s30  }
  0x14   :  { %91 = dma.hbm_to_vmem [thread:$0]  %s87_s2, 256, %s89_s4, [#allocation12]  }
  0x15   :  { %1350 = dma.done.wait [#allocation3], 128  }
  0x16   :  { %1351 = vsyncadd [#allocation3], 4294967168 }
  0x17   :  { %1352 = dma.done.wait [#allocation6], 4352  }
  0x18   :  { %1353 = vsyncadd [#allocation6], 4294962944 }
  0x19   :  { %1354 = dma.done.wait [#allocation9], 4096  }
  0x1a   :  { %1355 = vsyncadd [#allocation9], 4294963200 }
  0x1b   :  { %1356 = dma.done.wait [#allocation12], 256  }
  0x1c   :  { %1357 = vsyncadd [#allocation12], 4294967040  ;;  %v840_v0 = vld [vmem:[#allocation5 + $0x8] sm:$0xf]  ;;  %v1101_v1 = vld [vmem:[#allocation5 + $0x8] sm:$0x30] }
  0x1d   :  { %vm144_vm0 = vcmask 1045504   ;;  %v841_v2 = vor.u32 %v1101_v1, %v840_v0  ;;  %v1109_v3 = vld [vmem:[#allocation7 + $0x38] sm:$0xff]  ;;  %v1108_v5 = vld [vmem:[#allocation7 + $0x30] sm:$0xff]  ;;  %v1099_v7 = vld [vmem:[#allocation2] sm:$0xff]  ;;  %vm140_vm1 = vcmask 228352   ;;  %s1370_s5 = smov [#allocation13]  }
  0x1e   :  { %232 = vmatpush.bf16.msra.mxu1 %v1109_v3  ;;  %v1100_v6 = vld [vmem:[#allocation5] sm:$0xff]  ;;  %v1107_v8 = vld [vmem:[#allocation7 + $0x28] sm:$0xff]  ;;  %v1106_v9 = vld [vmem:[#allocation7 + $0x20] sm:$0xff]  ;;  %s812_s26 = sshll.u32 %s1370_s5, 4  ;;  %s814_s7 = sshll.u32 %s1448_s6, 4  ;;  %s813_s26 = int_to_ptr.vmem [resolvable:$true] %s812_s26  ;;  %s815_s7 = int_to_ptr.hbm [resolvable:$true] %s814_s7 }
  0x1f   :  { %v146_v4 = vsel %vm144_vm0, %v841_v2, 0  ;;  %v1105_v10 = vld [vmem:[#allocation7 + $0x18] sm:$0xff]  ;;  %v1104_v11 = vld [vmem:[#allocation7 + $0x10] sm:$0xff]  ;;  %v1103_v12 = vld [vmem:[#allocation7 + $0x8] sm:$0xff] }
  0x20   :  { %154 = vmatpush.bf16.msra.mxu0 %v146_v4  ;;  %v1102_v13 = vld [vmem:[#allocation7] sm:$0xff]  ;;  %v1117_v14 = vld [vmem:[#allocation7 + $0x78] sm:$0xff]  ;;  %v1116_v15 = vld [vmem:[#allocation7 + $0x70] sm:$0xff] }
  0x21   :  { %317 = vmatpush.bf16.msra.mxu2 %v1117_v14  ;;  %v1115_v16 = vld [vmem:[#allocation7 + $0x68] sm:$0xff]  ;;  %v1114_v17 = vld [vmem:[#allocation7 + $0x60] sm:$0xff]  ;;  %v1113_v28 = vld [vmem:[#allocation7 + $0x58] sm:$0xff] }
  0x22   :  { %233 = vmatpush.bf16.msra.mxu1 %v1108_v5  ;;  %v123_v19 = vld [vmem:[#allocation11] ss:$0 sm:$0xff]  ;;  %v1112_v29 = vld [vmem:[#allocation7 + $0x50] sm:$0xff]  ;;  %v1111_v30 = vld [vmem:[#allocation7 + $0x48] sm:$0xff] }
  0x23   :  { %v1110_v31 = vld [vmem:[#allocation7 + $0x40] sm:$0xff]  ;;  %v965_v32 = vld [vmem:[#allocation8 + $0x70] sm:$0xf]  ;;  %v1133_v33 = vld [vmem:[#allocation8 + $0x74] sm:$0xf0] }
  0x24   :  { %155 = vmatpush.bf16.msra.mxu0 %v1100_v6  ;;  %v1132_v34 = vld [vmem:[#allocation8 + $0x74] sm:$0xf]  ;;  %v966_v35 = vor.u32 %v1133_v33, %v965_v32  ;;  %v967_v36 = vld [vmem:[#allocation8 + $0x78] sm:$0xf0]  ;;  %v957_v37 = vld [vmem:[#allocation8 + $0x60] sm:$0xf] }
  0x25   :  { %318 = vmatpush.bf16.msra.mxu2 %v1116_v15  ;;  %v1131_v38 = vld [vmem:[#allocation8 + $0x64] sm:$0xf0]  ;;  %v970_v39 = vor.u32 %v1132_v34, %v967_v36  ;;  %v1130_v40 = vld [vmem:[#allocation8 + $0x64] sm:$0xf]  ;;  %v959_v41 = vld [vmem:[#allocation8 + $0x68] sm:$0xf0] }
  0x26   :  { %234 = vmatpush.bf16.msra.mxu1 %v1107_v8  ;;  %439 = vmatpush.bf16.msra.mxu3 %v966_v35  ;;  %v958_v42 = vor.u32 %v1131_v38, %v957_v37  ;;  %v962_v43 = vor.u32 %v1130_v40, %v959_v41  ;;  %v949_v44 = vld [vmem:[#allocation8 + $0x50] sm:$0xf]  ;;  %v1129_v45 = vld [vmem:[#allocation8 + $0x54] sm:$0xf0]  ;;  %v1128_v46 = vld [vmem:[#allocation8 + $0x54] sm:$0xf] }
  0x27   :  { %842 = vmatmul.msk.bf16.vlgmr.msra.gmra.mxu0 %vm140_vm1, %v1099_v7  ;;  %v951_v47 = vld [vmem:[#allocation8 + $0x58] sm:$0xf0]  ;;  %v950_v48 = vor.u32 %v1129_v45, %v949_v44  ;;  %v941_v50 = vld [vmem:[#allocation8 + $0x40] sm:$0xf]  ;;  %v1127_v51 = vld [vmem:[#allocation8 + $0x44] sm:$0xf0] }
  0x28   :  { %453 = vmatpush.bf16.msrb.mxu0 %v970_v39  ;;  %v954_v49 = vor.u32 %v1128_v46, %v951_v47  ;;  %v1126_v52 = vld [vmem:[#allocation8 + $0x44] sm:$0xf]  ;;  %v943_v53 = vld [vmem:[#allocation8 + $0x48] sm:$0xf0]  ;;  %v942_v54 = vor.u32 %v1127_v51, %v941_v50  ;;  %v183_v57 = vld [vmem:[#allocation11 + $0x1] ss:$0 sm:$0xff] }
  0x29   :  { %319 = vmatpush.bf16.msra.mxu2 %v1115_v16  ;;  %v946_v55 = vor.u32 %v1126_v52, %v943_v53  ;;  %v933_v2 = vld [vmem:[#allocation8 + $0x30] sm:$0xf]  ;;  %v1125_v3 = vld [vmem:[#allocation8 + $0x34] sm:$0xf0]  ;;  %v1124_v4 = vld [vmem:[#allocation8 + $0x34] sm:$0xf] }
  0x2a   :  { %235 = vmatpush.bf16.msra.mxu1 %v1106_v9  ;;  %440 = vmatpush.bf16.msra.mxu3 %v958_v42  ;;  %v934_v5 = vor.u32 %v1125_v3, %v933_v2  ;;  %v935_v6 = vld [vmem:[#allocation8 + $0x38] sm:$0xf0]  ;;  %v925_v8 = vld [vmem:[#allocation8 + $0x20] sm:$0xf]  ;;  %v1123_v9 = vld [vmem:[#allocation8 + $0x24] sm:$0xf0] }
  0x2b   :  { %v938_v7 = vor.u32 %v1124_v4, %v935_v6  ;;  %v917_v14 = vld [vmem:[#allocation8 + $0x10] sm:$0xf]  ;;  %v1121_v15 = vld [vmem:[#allocation8 + $0x14] sm:$0xf0]  ;;  %v1120_v16 = vld [vmem:[#allocation8 + $0x14] sm:$0xf] }
  0x2c   :  { %454 = vmatpush.bf16.msrb.mxu0 %v962_v43  ;;  %v268_v33 = vld [vmem:[#allocation11 + $0x2] ss:$0 sm:$0xff]  ;;  %v1139_v42 = vld [vmem:[#allocation10 + $0x28] sm:$0xff]  ;;  %v1145_v43 = vld [vmem:[#allocation10 + $0x58] sm:$0xff] }
  0x2d   :  { %320 = vmatpush.bf16.msra.mxu2 %v1114_v17  ;;  %v918_v17 = vor.u32 %v1121_v15, %v917_v14  ;;  %v1138_v44 = vld [vmem:[#allocation10 + $0x20] sm:$0xff]  ;;  %v1144_v45 = vld [vmem:[#allocation10 + $0x50] sm:$0xff]  ;;  %v1137_v46 = vld [vmem:[#allocation10 + $0x18] sm:$0xff] }
  0x2e   :  { %236 = vmatpush.bf16.msra.mxu1 %v1105_v10  ;;  %441 = vmatpush.bf16.msra.mxu3 %v950_v48  ;;  %v1122_v10 = vld [vmem:[#allocation8 + $0x24] sm:$0xf]  ;;  %v1143_v47 = vld [vmem:[#allocation10 + $0x48] sm:$0xff]  ;;  %v1136_v48 = vld [vmem:[#allocation10 + $0x10] sm:$0xff] }
  0x2f   :  { %v1135_v50 = vld [vmem:[#allocation10 + $0x8] sm:$0xff]  ;;  %v1134_v51 = vld [vmem:[#allocation10] sm:$0xff]  ;;  %v1157_v52 = vld [vmem:[#allocation7 + $0xb8] sm:$0xff] }
  0x30   :  { %455 = vmatpush.bf16.msrb.mxu0 %v954_v49  ;;  %v1142_v49 = vld [vmem:[#allocation10 + $0x40] sm:$0xff]  ;;  %v1156_v53 = vld [vmem:[#allocation7 + $0xb0] sm:$0xff]  ;;  %v1151_v15 = vld [vmem:[#allocation7 + $0x88] sm:$0xff] }
  0x31   :  { %321 = vmatpush.bf16.msra.mxu2 %v1113_v28  ;;  %v1148_v28 = vld [vmem:[#allocation10 + $0x70] sm:$0xff] }
  0x32   :  { %237 = vmatpush.bf16.msra.mxu1 %v1104_v11  ;;  %442 = vmatpush.bf16.msra.mxu3 %v942_v54  ;;  %v926_v11 = vor.u32 %v1123_v9, %v925_v8  ;;  %v1155_v54 = vld [vmem:[#allocation7 + $0xa8] sm:$0xff]  ;;  %v1152_v14 = vld [vmem:[#allocation7 + $0x90] sm:$0xff] }
  0x34   :  { %456 = vmatpush.bf16.msrb.mxu0 %v946_v55  ;;  %v353_v55 = vld [vmem:[#allocation11 + $0x3] ss:$8 sm:$0x3] }
  0x35   :  { %322 = vmatpush.bf16.msra.mxu2 %v1112_v29  ;;  %v1140_v29 = vld [vmem:[#allocation10 + $0x30] sm:$0xff] }
  0x36   :  { %238 = vmatpush.bf16.msra.mxu1 %v1103_v12  ;;  %443 = vmatpush.bf16.msra.mxu3 %v934_v5  ;;  %v927_v12 = vld [vmem:[#allocation8 + $0x28] sm:$0xf0] }
  0x38   :  { %457 = vmatpush.bf16.msrb.mxu0 %v938_v7 }
  0x39   :  { %323 = vmatpush.bf16.msra.mxu2 %v1111_v30  ;;  %v1147_v30 = vld [vmem:[#allocation10 + $0x68] sm:$0xff] }
  0x3a   :  { %239 = vmatpush.bf16.msra.mxu1 %v1102_v13  ;;  %v930_v13 = vor.u32 %v1122_v10, %v927_v12  ;;  %444 = vmatpush.bf16.msra.mxu3 %v926_v11  ;;  %v1154_v12 = vld [vmem:[#allocation7 + $0xa0] sm:$0xff] }
  0x3c   :  { %458 = vmatpush.bf16.msrb.mxu0 %v930_v13  ;;  %v1153_v13 = vld [vmem:[#allocation7 + $0x98] sm:$0xff] }
  0x3d   :  { %324 = vmatpush.bf16.msra.mxu2 %v1110_v31  ;;  %v1146_v31 = vld [vmem:[#allocation10 + $0x60] sm:$0xff] }
  0x3e   :  { %445 = vmatpush.bf16.msra.mxu3 %v918_v17  ;;  %v1165_v17 = vld [vmem:[#allocation7 + $0xf8] sm:$0xff] }
  0xa4   :  { %v157_v18 = vpop.f32.mrf.mxu0 }
  0xa5   :  { %v158_v20 = vadd.f32 %v157_v18, %v123_v19  ;;  %v919_v18 = vld [vmem:[#allocation8 + $0x18] sm:$0xf0] }
  0xa7   :  { %v162_v22 = vmax.f32 %v158_v20, 0.0  ;;  %v909_v20 = vld [vmem:[#allocation8] sm:$0xf] }
  0xa9   :  { %v164_v25 = vmin.f32 %v162_v22, 6.0  ;;  %v1118_v22 = vld [vmem:[#allocation8 + $0x4] sm:$0xf] }
  0xac   :  { %v159_v21 = vpop.f32.mrf.mxu0 }
  0xad   :  { %v160_v23 = vadd.f32 %v159_v21, %v123_v19  ;;  %v922_v19 = vor.u32 %v1120_v16, %v919_v18  ;;  %v1119_v21 = vld [vmem:[#allocation8 + $0x4] sm:$0xf0]  ;;  %v1150_v16 = vld [vmem:[#allocation7 + $0x80] sm:$0xff]  ;;  %v1164_v18 = vld [vmem:[#allocation7 + $0xf0] sm:$0xff] }
  0xaf   :  { %v163_v24 = vmax.f32 %v160_v23, 0.0  ;;  %459 = vmatpush.bf16.msrb.mxu0 %v922_v19  ;;  %v910_v23 = vor.u32 %v1119_v21, %v909_v20  ;;  %v1163_v19 = vld [vmem:[#allocation7 + $0xe8] sm:$0xff]  ;;  %v1162_v20 = vld [vmem:[#allocation7 + $0xe0] sm:$0xff] }
  0xb0   :  { %v509_v21 = vld [vmem:[#allocation11 + $0x4] ss:$0 sm:$0xff] }
  0xb1   :  { %v165_v26 = vmin.f32 %v163_v24, 6.0  ;;  %v911_v24 = vld [vmem:[#allocation8 + $0x8] sm:$0xf0]  ;;  %446 = vmatpush.bf16.msra.mxu3 %v910_v23 }
  0xb3   :  { %v166_v27 = vpack.c.bf16 %v165_v26, %v164_v25  ;;  %v914_v25 = vor.u32 %v1118_v22, %v911_v24  ;;  %v1149_v26 = vld [vmem:[#allocation10 + $0x78] sm:$0xff] }
  0xb4   :  { %620 = vmatpush.bf16.msrb.mxu2 %v1149_v26 }
  0xb5   :  { %240 = vmatmul.bf16.vlgmr.msra.gmra.mxu1 %v166_v27  ;;  %460 = vmatpush.bf16.msrb.mxu0 %v914_v25  ;;  %v1141_v27 = vld [vmem:[#allocation10 + $0x38] sm:$0xff] }
  0xb6   :  { %606 = vmatpush.bf16.msrb.mxu1 %v1141_v27  ;;  %705 = vmatpush.bf16.msrb.mxu3 %v1157_v52 }
  0xb8   :  { %621 = vmatpush.bf16.msrb.mxu2 %v1148_v28 }
  0xb9   :  { %790 = vmatpush.bf16.msra.mxu0 %v1165_v17 }
  0xba   :  { %607 = vmatpush.bf16.msrb.mxu1 %v1140_v29  ;;  %706 = vmatpush.bf16.msrb.mxu3 %v1156_v53 }
  0xbc   :  { %622 = vmatpush.bf16.msrb.mxu2 %v1147_v30 }
  0xbd   :  { %791 = vmatpush.bf16.msra.mxu0 %v1164_v18 }
  0xbe   :  { %608 = vmatpush.bf16.msrb.mxu1 %v1139_v42  ;;  %707 = vmatpush.bf16.msrb.mxu3 %v1155_v54 }
  0xc0   :  { %623 = vmatpush.bf16.msrb.mxu2 %v1146_v31 }
  0xc1   :  { %792 = vmatpush.bf16.msra.mxu0 %v1163_v19 }
  0xc2   :  { %609 = vmatpush.bf16.msrb.mxu1 %v1138_v44  ;;  %708 = vmatpush.bf16.msrb.mxu3 %v1154_v12 }
  0xc4   :  { %624 = vmatpush.bf16.msrb.mxu2 %v1145_v43 }
  0xc5   :  { %793 = vmatpush.bf16.msra.mxu0 %v1162_v20 }
  0xc6   :  { %610 = vmatpush.bf16.msrb.mxu1 %v1137_v46  ;;  %709 = vmatpush.bf16.msrb.mxu3 %v1153_v13 }
  0xc8   :  { %625 = vmatpush.bf16.msrb.mxu2 %v1144_v45 }
  0xca   :  { %611 = vmatpush.bf16.msrb.mxu1 %v1136_v48  ;;  %710 = vmatpush.bf16.msrb.mxu3 %v1152_v14 }
  0xcc   :  { %626 = vmatpush.bf16.msrb.mxu2 %v1143_v47 }
  0xce   :  { %612 = vmatpush.bf16.msrb.mxu1 %v1135_v50  ;;  %711 = vmatpush.bf16.msrb.mxu3 %v1151_v15  ;;  %v741_v50 = vld [vmem:[#allocation11 + $0x6] ss:$0 sm:$0xff] }
  0xd0   :  { %627 = vmatpush.bf16.msrb.mxu2 %v1142_v49 }
  0xd2   :  { %613 = vmatpush.bf16.msrb.mxu1 %v1134_v51  ;;  %712 = vmatpush.bf16.msrb.mxu3 %v1150_v16 }
 0x132   :  { %v241_v56 = vpop.f32.mrf.mxu1 }
 0x133   :  { %v242_v58 = vadd.f32 %v241_v56, %v183_v57 }
 0x135   :  { %v246_v60 = vmax.f32 %v242_v58, 0.0 }
 0x137   :  { %v248_v63 = vmin.f32 %v246_v60, 6.0  ;;  %v355_v60 = vperm.slane %v353_v55, 0 }
 0x13a   :  { %v243_v59 = vpop.f32.mrf.mxu1 }
 0x13b   :  { %v244_v61 = vadd.f32 %v243_v59, %v183_v57  ;;  %v356_v57 = vperm.slane %v353_v55, 1 }
 0x13d   :  { %v247_v62 = vmax.f32 %v244_v61, 0.0 }
 0x13f   :  { %v249_v0 = vmin.f32 %v247_v62, 6.0 }
 0x141   :  { %v250_v1 = vpack.c.bf16 %v249_v0, %v248_v63 }
 0x143   :  { %325 = vmatmul.bf16.vlgmr.msra.gmra.mxu2 %v250_v1 }
 0x1c6   :  { %v326_v32 = vpop.f32.mrf.mxu2 }
 0x1c7   :  { %v327_v34 = vadd.f32 %v326_v32, %v268_v33 }
 0x1c9   :  { %v331_v36 = vmax.f32 %v327_v34, 0.0 }
 0x1cb   :  { %v333_v39 = vmin.f32 %v331_v36, 6.0  ;;  %v1160_v36 = vld [vmem:[#allocation7 + $0xd0] sm:$0xff] }
 0x1ce   :  { %v328_v35 = vpop.f32.mrf.mxu2 }
 0x1cf   :  { %v329_v37 = vadd.f32 %v328_v35, %v268_v33  ;;  %v1161_v35 = vld [vmem:[#allocation7 + $0xd8] sm:$0xff] }
 0x1d0   :  { %794 = vmatpush.bf16.msra.mxu0 %v1161_v35 }
 0x1d1   :  { %v332_v38 = vmax.f32 %v329_v37, 0.0  ;;  %v1159_v37 = vld [vmem:[#allocation7 + $0xc8] sm:$0xff] }
 0x1d3   :  { %v334_v40 = vmin.f32 %v332_v38, 6.0  ;;  %v1158_v38 = vld [vmem:[#allocation7 + $0xc0] sm:$0xff] }
 0x1d4   :  { %795 = vmatpush.bf16.msra.mxu0 %v1160_v36 }
 0x1d5   :  { %v335_v41 = vpack.c.bf16 %v334_v40, %v333_v39  ;;  %v656_v40 = vld [vmem:[#allocation11 + $0x5] ss:$0 sm:$0xff] }
 0x1d7   :  { %447 = vmatmul.bf16.vlgmr.msra.gmra.mxu3 %v335_v41  ;;  %461 = vmatmul.bf16.vlgmr.msrb.gmra.mxu0 %v335_v41 }
 0x1d8   :  { %796 = vmatpush.bf16.msra.mxu0 %v1159_v37 }
 0x1dc   :  { %797 = vmatpush.bf16.msra.mxu0 %v1158_v38 }
 0x254   :  { %v462_v56 = vpop.f32.mrf.mxu0 }
 0x255   :  { %v463_v58 = vadd.f32 %v462_v56, %v356_v57 }
 0x257   :  { %v468_v62 = vmax.f32 %v463_v58, 0.0 }
 0x259   :  { %v472_v2 = vmin.f32 %v468_v62, 6.0 }
 0x25a   :  { %v448_v59 = vpop.f32.mrf.mxu3 }
 0x25b   :  { %v449_v0 = vadd.f32 %v448_v59, %v355_v60 }
 0x25c   :  { %v464_v61 = vpop.f32.mrf.mxu0 }
 0x25d   :  { %v465_v63 = vadd.f32 %v464_v61, %v356_v57  ;;  %v467_v5 = vmax.f32 %v449_v0, 0.0 }
 0x25f   :  { %v470_v1 = vmax.f32 %v465_v63, 0.0  ;;  %v471_v9 = vmin.f32 %v467_v5, 6.0 }
 0x261   :  { %v474_v3 = vmin.f32 %v470_v1, 6.0 }
 0x262   :  { %v450_v4 = vpop.f32.mrf.mxu3 }
 0x263   :  { %v476_v6 = vpack.c.bf16 %v474_v3, %v472_v2  ;;  %v451_v7 = vadd.f32 %v450_v4, %v355_v60 }
 0x265   :  { %v469_v8 = vmax.f32 %v451_v7, 0.0  ;;  %628 = vmatmul.bf16.vlgmr.msrb.gmra.mxu2 %v476_v6 }
 0x267   :  { %v473_v10 = vmin.f32 %v469_v8, 6.0 }
 0x269   :  { %v475_v11 = vpack.c.bf16 %v473_v10, %v471_v9 }
 0x26b   :  { %614 = vmatmul.bf16.vlgmr.msrb.gmra.mxu1 %v475_v11 }
 0x2e8   :  { %v615_v22 = vpop.f32.mrf.mxu1  ;;  %v629_v23 = vpop.f32.mrf.mxu2 }
 0x2e9   :  { %v616_v24 = vadd.f32 %v615_v22, %v509_v21 }
 0x2eb   :  { %v630_v25 = vadd.f32 %v629_v23, %v616_v24 }
 0x2ed   :  { %v634_v29 = vmax.f32 %v630_v25, 0.0 }
 0x2ef   :  { %v636_v32 = vmin.f32 %v634_v29, 6.0 }
 0x2f0   :  { %v617_v26 = vpop.f32.mrf.mxu1  ;;  %v631_v28 = vpop.f32.mrf.mxu2 }
 0x2f1   :  { %v618_v27 = vadd.f32 %v617_v26, %v509_v21 }
 0x2f3   :  { %v632_v30 = vadd.f32 %v631_v28, %v618_v27 }
 0x2f5   :  { %v635_v31 = vmax.f32 %v632_v30, 0.0 }
 0x2f7   :  { %v637_v33 = vmin.f32 %v635_v31, 6.0 }
 0x2f9   :  { %v638_v34 = vpack.c.bf16 %v637_v33, %v636_v32 }
 0x2fb   :  { %713 = vmatmul.bf16.vlgmr.msrb.gmra.mxu3 %v638_v34 }
 0x37e   :  { %v714_v39 = vpop.f32.mrf.mxu3 }
 0x37f   :  { %v715_v41 = vadd.f32 %v714_v39, %v656_v40 }
 0x381   :  { %v719_v43 = vmax.f32 %v715_v41, 0.0 }
 0x383   :  { %v721_v46 = vmin.f32 %v719_v43, 6.0 }
 0x386   :  { %v716_v42 = vpop.f32.mrf.mxu3 }
 0x387   :  { %v717_v44 = vadd.f32 %v716_v42, %v656_v40 }
 0x389   :  { %v720_v45 = vmax.f32 %v717_v44, 0.0 }
 0x38b   :  { %v722_v47 = vmin.f32 %v720_v45, 6.0 }
 0x38d   :  { %v723_v48 = vpack.c.bf16 %v722_v47, %v721_v46 }
 0x38f   :  { %798 = vmatmul.bf16.vlgmr.msra.gmra.mxu0 %v723_v48 }
 0x40c   :  { %v799_v49 = vpop.f32.mrf.mxu0 }
 0x40d   :  { %v800_v52 = vadd.f32 %v799_v49, %v741_v50 }
 0x414   :  { %v801_v51 = vpop.f32.mrf.mxu0 }
 0x415   :  { %v802_v53 = vadd.f32 %v801_v51, %v741_v50 }
 0x417   :  { %v1169_v54 = vpack.c.bf16 %v802_v53, %v800_v52 }
 0x419   :  { %1170 = vst [vmem:[#allocation13] sm:$0xff] %v1169_v54  }
 0x41a   :  { %820 = dma.vmem_to_hbm [thread:$0]  %s813_s26, 128, %s815_s7, [#allocation4], %s1361_s29, %s1361_s29, %s1362_s30  }
 0x41b   :  { %1358 = dma.done.wait [#allocation4], 128  }
 0x41c   :  { %1359 = vsyncadd [#allocation4], 4294967168 }
 0x41d   :  { %825 = vsyncpa [#allocation3], 1 }
 0x41e   :  { %826 = vsyncpa [#allocation6], 1 }
 0x41f   :  { %827 = vsyncpa [#allocation9], 1 }
 0x420   :  { %828 = vsyncpa [#allocation12], 1 }
 0x421   :  { %829 = vsyncpa [#allocation4], 1 }

</bundles_post_ra>
